<compile_context>
chip_gen: v6e
topology: v6e:2x2x1
jax: 0.10.0
libtpu: 0.0.40
codegen_flags: <defaults>
</compile_context>

<pallas_src>
import jax
import jax.numpy as jnp
import numpy as np
from jax.experimental import pallas as pl
from jax.experimental.pallas import tpu as pltpu


# ------------------------------------------------------------------ kernels

def _affine_kernel(x_ref, w_ref, b_ref, o_ref):
    """Fully collapsed eval-mode network: out = x @ W_eff + b_eff (single MXU pass)."""
    x = x_ref[...].astype(w_ref.dtype)
    acc = jnp.dot(x, w_ref[...], preferred_element_type=jnp.float32)
    o_ref[...] = (acc + b_ref[...]).astype(o_ref.dtype)


def _mlp_kernel(x_ref, w1_ref, b1_ref, w2_ref, b2_ref, wt_ref, bt_ref, o_ref):
    """Layered path: Linear1 / Linear2 kept separate; Linears 3..5 pre-folded into (wt, bt).

    Accumulation and bias adds stay f32 even when the weights are bf16.
    """
    x = x_ref[...].astype(w1_ref.dtype)
    h = jnp.dot(x, w1_ref[...], preferred_element_type=jnp.float32) + b1_ref[...]
    # nn.Dropout(0.2): identity in eval mode.
    # TODO(synk): training-mode stochastic dropout (pltpu.prng_seed / prng_random_bits)
    # not implemented.
    h = jnp.dot(h.astype(w2_ref.dtype), w2_ref[...],
                preferred_element_type=jnp.float32) + b2_ref[...]
    # Dropout(0.2), Linear(128,64), Dropout(0.1), Linear(64,16), Linear(16,1):
    # dropout is identity in eval mode, so the three lane-sparse tail Linears
    # (<0.1% of FLOPs, but 3 separate MXU passes before) are folded offline into
    # one (128, 1) matmul.
    h = jnp.dot(h.astype(wt_ref.dtype), wt_ref[...],
                preferred_element_type=jnp.float32) + bt_ref[...]
    o_ref[...] = h.astype(o_ref.dtype)


# ------------------------------------------------------------------ launcher

def _round_up(n, m):
    return ((n + m - 1) // m) * m


def _launch(kernel, x, weight_args, batch_tile):
    B, F = x.shape
    # Tile: big enough to saturate MXU sublanes and amortize grid-step overhead, but
    # never larger than the (8-row aligned) batch itself.
    tb = min(batch_tile, _round_up(B, 8))
    tb = _round_up(tb, 8)
    B_pad = _round_up(B, tb)
    if B_pad != B:                       # pad only when actually needed
        x = jnp.pad(x, ((0, B_pad - B), (0, 0)))

    def resident(a):                     # full-array block, same block every grid step
        return pl.BlockSpec(a.shape, lambda i: (0,) * a.ndim)

    out = pl.pallas_call(
        kernel,
        out_shape=jax.ShapeDtypeStruct((B_pad, 1), jnp.float32),
        grid_spec=pltpu.PrefetchScalarGridSpec(
            num_scalar_prefetch=0,
            grid=(B_pad // tb,),
            in_specs=[pl.BlockSpec((tb, F), lambda i: (i, 0))]
                     + [resident(a) for a in weight_args],
            # Output is only 1 lane wide; with the large batch tile it is a handful of
            # (tb, 1) DMAs, so a lane-dense transposed layout is not worth the extra
            # in-kernel relayout.
            out_specs=pl.BlockSpec((tb, 1), lambda i: (i, 0)),
        ),
        compiler_params=pltpu.CompilerParams(
            # "parallel" batch axis -> Mosaic may shard grid steps across v7x's 2 TCs.
            dimension_semantics=("parallel",),
            # Headroom for 256+-row tiles on v5e (16 MiB default scoped VMEM).
            vmem_limit_bytes=64 * 1024 * 1024,
        ),
    )(x, *weight_args)
    return out[:B]


# ------------------------------------------------------------------ param prep

def collapse_params(params):
    """Fold all five Linears (eval mode: dropout == identity) into one affine map."""
    w_eff, b_eff = params[0]
    for w, b in params[1:]:
        w_eff = w_eff @ w
        b_eff = b_eff @ w + b
    return w_eff, b_eff


def fold_tail(params):
    """Keep Linear1 / Linear2; fold Linears 3..5 (eval mode) into one (128, 1) layer."""
    (w1, b1), (w2, b2), (w3, b3), (w4, b4), (w5, b5) = params
    w45 = w4 @ w5                       # always legal (no dropout between 4 and 5)
    b45 = b4 @ w5 + b5
    wt = w3 @ w45                       # legal in eval mode (Dropout(0.1) == identity)
    bt = b3 @ w45 + b45
    return (w1, b1), (w2, b2), (wt, bt)


def aesthetic_predictor(x, params, *, batch_tile=256, collapse=True, weight_dtype=None):
    """Eval-mode forward pass of AestheticPredictor.

    x: (B, input_size) float32.  params: 5 x (W, b), W stored as (in, out), b as (1, out).
    collapse=True  -> single fused GEMV  (x @ W_eff + b_eff), the fast path.
    collapse=False -> Linear1 / Linear2 kept as separate MXU passes, tail folded.
    weight_dtype   -> e.g. jnp.bfloat16 for the two large weight matrices
                      (f32 accumulation, f32 bias adds).
    """
    if collapse:
        w_eff, b_eff = collapse_params(params)
        # W_eff is (input_size, 1): bf16 buys nothing here, keep f32 for accuracy.
        return _launch(_affine_kernel, x, (w_eff, b_eff), batch_tile)

    (w1, b1), (w2, b2), (wt, bt) = fold_tail(params)
    if weight_dtype is not None:
        w1 = w1.astype(weight_dtype)
        w2 = w2.astype(weight_dtype)
    return _launch(_mlp_kernel, x, (w1, b1, w2, b2, wt, bt), batch_tile)


# ------------------------------------------------------------------ reference / init

def init_params(key, input_size):
    """Deterministic init matching the nn.Linear shapes (W stored as (in, out))."""
    dims = [input_size, 1024, 128, 64, 16, 1]
    params = []
    for i in range(len(dims) - 1):
        fan_in, fan_out = dims[i], dims[i + 1]
        key, kw, kb = jax.random.split(key, 3)
        bound = 1.0 / np.sqrt(fan_in)
        w = jax.random.uniform(kw, (fan_in, fan_out), jnp.float32, -bound, bound)
        b = jax.random.uniform(kb, (1, fan_out), jnp.float32, -bound, bound)
        params.append((w, b))
    return params


def reference(x, params):
    h = x
    for w, b in params:
        h = h @ w + b                    # dropout is identity in eval mode
    return h


if __name__ == "__main__":
    input_size = 32     # small, consistent with Linear(input_size, 1024)
    batch = 2

    key = jax.random.PRNGKey(0)
    key, kx = jax.random.split(key)
    x = jax.random.normal(kx, (batch, input_size), jnp.float32)
    params = init_params(key, input_size)

    ref = reference(x, params)

    # 1) Fully collapsed eval-mode kernel (single GEMV) -- the fast path.
    out_c = jax.block_until_ready(aesthetic_predictor(x, params, collapse=True))
    assert out_c.shape == (batch, 1), out_c.shape
    np.testing.assert_allclose(np.asarray(out_c), np.asarray(ref), rtol=1e-4, atol=1e-4)

    # 2) Layered kernel (Linear1 / Linear2 separate, tail folded), f32 weights.
    out_l = jax.block_until_ready(aesthetic_predictor(x, params, collapse=False))
    assert out_l.shape == (batch, 1), out_l.shape
    np.testing.assert_allclose(np.asarray(out_l), np.asarray(ref), rtol=1e-4, atol=1e-4)

    # 3) Layered kernel with bf16 weights on the large layers (f32 accumulation).
    out_b = jax.block_until_ready(
        aesthetic_predictor(x, params, collapse=False, weight_dtype=jnp.bfloat16))
    assert out_b.shape == (batch, 1), out_b.shape
    np.testing.assert_allclose(np.asarray(out_b), np.asarray(ref), rtol=5e-2, atol=5e-2)

    print("KERNEL_OK")
</pallas_src>

<mosaic_0001>
module attributes {stable_mosaic.version = 11 : i64} {
  func.func @_affine_kernel(%arg0: i32, %arg1: memref<8x32xf32, #tpu.memory_space<vmem>>, %arg2: memref<32x1xf32, #tpu.memory_space<vmem>>, %arg3: memref<1x1xf32, #tpu.memory_space<vmem>>, %arg4: memref<8x1xf32, #tpu.memory_space<vmem>>) attributes {dimension_semantics = [#tpu.dimension_semantics<parallel>], iteration_bounds = array<i64: 1>, scalar_prefetch = 0 : i64, scratch_operands = 0 : i64, tpu.core_type = #tpu.core_type<tc>, window_params = [{transform_indices = @transform_0, window_bounds = array<i64: 8, 32>}, {pipeline_mode = #tpu.pipeline_mode<synchronous>, transform_indices = @transform_1, window_bounds = array<i64: 32, 1>}, {pipeline_mode = #tpu.pipeline_mode<synchronous>, transform_indices = @transform_2, window_bounds = array<i64: 1, 1>}, {transform_indices = @transform_3, window_bounds = array<i64: 8, 1>}]} {
    %c0 = arith.constant 0 : index
    %c0_0 = arith.constant 0 : index
    %0 = vector.load %arg1[%c0, %c0_0] : memref<8x32xf32, #tpu.memory_space<vmem>>, vector<8x32xf32>
    %c0_1 = arith.constant 0 : index
    %c0_2 = arith.constant 0 : index
    %1 = vector.load %arg2[%c0_1, %c0_2] : memref<32x1xf32, #tpu.memory_space<vmem>>, vector<32x1xf32>
    %cst = arith.constant dense<0.000000e+00> : vector<8x1xf32>
    %2 = tpu.matmul %0, %1, %cst {dimension_numbers = #tpu.dot_dimension_numbers<[1], [0], [0], [1], [0, 0, 1, 1], [], []>} : vector<8x32xf32>, vector<32x1xf32>, vector<8x1xf32> -> vector<8x1xf32>
    %c0_3 = arith.constant 0 : index
    %c0_4 = arith.constant 0 : index
    %3 = vector.load %arg3[%c0_3, %c0_4] : memref<1x1xf32, #tpu.memory_space<vmem>>, vector<1x1xf32>
    %4 = vector.broadcast %3 : vector<1x1xf32> to vector<8x1xf32>
    %5 = arith.addf %2, %4 : vector<8x1xf32>
    %c0_5 = arith.constant 0 : index
    %c0_6 = arith.constant 0 : index
    %6 = vector.load %arg4[%c0_5, %c0_6] : memref<8x1xf32, #tpu.memory_space<vmem>>, vector<8x1xf32>
    tpu.vector_store %arg4[%c0_5, %c0_6], %5 {strides = array<i32>} : memref<8x1xf32, #tpu.memory_space<vmem>>, vector<8x1xf32>,
    return
  }
  func.func @transform_0(%arg0: i32) -> (i32, i32) {
    %c0_i32 = arith.constant 0 : i32
    %c0_i32_0 = arith.constant 0 : i32
    return %arg0, %c0_i32 : i32, i32
  }
  func.func @transform_1(%arg0: i32) -> (i32, i32) {
    %c0_i32 = arith.constant 0 : i32
    %c0_i32_0 = arith.constant 0 : i32
    %c0_i32_1 = arith.constant 0 : i32
    return %c0_i32, %c0_i32_0 : i32, i32
  }
  func.func @transform_2(%arg0: i32) -> (i32, i32) {
    %c0_i32 = arith.constant 0 : i32
    %c0_i32_0 = arith.constant 0 : i32
    %c0_i32_1 = arith.constant 0 : i32
    return %c0_i32, %c0_i32_0 : i32, i32
  }
  func.func @transform_3(%arg0: i32) -> (i32, i32) {
    %c0_i32 = arith.constant 0 : i32
    %c0_i32_0 = arith.constant 0 : i32
    return %arg0, %c0_i32 : i32, i32
  }
}

</mosaic_0001>

<bundles_post_ra>
// kernel: tpu_custom_call.1
= control target key start
LH: loop header
LB: loop body
LE: loop exit
PB: predicated region body
PF: predicated region fallthrough
CT: control target
= control target key end

     0   :  { %v128_v0 = vmov 0.0   ;;  %vm129_vm0 = vmmov 0   ;;  %vm28_vm1 = vcmask 261120   ;;  %vm102_vm2 = vcmask 7168   ;;  %s171_s1 = inlined_call_operand.vmem [shape: f32[32,1], index: 1, kind: input, shape index: {}]   ;;  %s172_s2 = inlined_call_operand.<no memory space> [shape: f32[1,1], index: 2, kind: input, shape index: {}]   ;;  %s173_s0 = inlined_call_operand.vmem [shape: f32[8,32], index: 0, kind: input, shape index: {}]   ;;  %s174_s3 = inlined_call_operand.vmem [shape: f32[8,1], index: 3, kind: output, shape index: {}]  }
   0x1   :  { %115 = vmatprep.subr.mxu0 %v128_v0  ;;  %v20_v1 = vld [vmem:[%s171_s1 + $0x18] sm:$0xff]  ;;  %v19_v2 = vld [vmem:[%s171_s1 + $0x10] sm:$0xff]  ;;  %123 = vmatprep.mubr.msk.f32.mxu0 %vm129_vm0, %v128_v0  ;;  %v8_v3 = vstv %s172_s2  ;;  %v18_v4 = vld [vmem:[%s171_s1 + $0x8] sm:$0xff] }
   0x2   :  { %116 = vmatpush3.msra.mxu0 %v20_v1  ;;  %9 = vst [vmem:[#allocation2] sm:$0x1] %v8_v3  ;;  %v17_v5 = vld [vmem:[%s171_s1] sm:$0xff] }
   0x3   :  { %117 = vmatprep.subr.mxu0 %v128_v0  ;;  %v16_v6 = vld [vmem:[%s173_s0] sm:$0xff] }
   0x4   :  { %118 = vmatpush3.msra.mxu0 %v19_v2 }
   0x5   :  { %119 = vmatprep.subr.mxu0 %v128_v0 }
   0x6   :  { %120 = vmatpush3.msra.mxu0 %v18_v4 }
   0x7   :  { %121 = vmatprep.subr.mxu0 %v128_v0 }
   0x8   :  { %122 = vmatpush3.msra.mxu0 %v17_v5 }
   0x9   :  { %124 = vmatmul.mubr.msk.f32.vlgmr.msra.gmra.mxu0 %vm28_vm1, %v16_v6  ;;  %v108_v7 = vld [vmem:[#allocation2] ss:$0 sm:$0xff] }
  0xc9   :  { %v98_v8 = vpop.f32.mrf.mxu0 }
  0xca   :  { %v99_v9 = vadd.f32 %v108_v7, %v98_v8 }
  0xcb   :  { %v125_v10 = vpop.f32.mrf.mxu0 }
  0xcc   :  { %103 = vst.msk [vmem:[%s174_s3] sm:$0xff] %vm102_vm2, %v99_v9 }

</bundles_post_ra>
